<compile_context>
chip_gen: v5e
topology: v5e:2x2
jax: 0.10.0
libtpu: 0.0.40
codegen_flags: <defaults>
</compile_context>

<pallas_src>
import jax
import jax.numpy as jnp
from jax.experimental import pallas as pl
from jax.experimental.pallas import tpu as pltpu


_LANES = 128
_MAX_ROW_TILE = 512          # rows per tile (multiple of 8); ~85% HBM roofline
_VMEM_LIMIT = 32 * 1024 * 1024


def _round_up(x, m):
    return ((x + m - 1) // m) * m


def _cdiv(a, b):
    return -(-a // b)


# --------------------------------------------------------------------------
# Kernels (tiled streaming reductions with (sum, count) SMEM accumulator)
# --------------------------------------------------------------------------
def _masked_bce_sum_kernel(x_ref, t_ref, out_ref, acc_ref):
    # x_ref/t_ref: (TILE, 128) blocks.  Targets that are NaN (unlabeled entries
    # in the multi-label branch and wrapper padding) are masked out.
    step = pl.program_id(0)

    @pl.when(step == 0)
    def _init():
        acc_ref[0] = jnp.float32(0.0)
        acc_ref[1] = jnp.float32(0.0)

    x = x_ref[...].astype(jnp.float32)
    t = t_ref[...].astype(jnp.float32)
    mask = t == t                                   # False where target is NaN
    maskf = mask.astype(jnp.float32)
    t_safe = jnp.where(mask, t, 0.0)
    # Numerically stable BCE-with-logits: max(x,0) - x*t + log1p(exp(-|x|))
    elem = jnp.maximum(x, 0.0) - x * t_safe + jnp.log1p(jnp.exp(-jnp.abs(x)))
    acc_ref[0] += jnp.sum(elem * maskf)
    acc_ref[1] += jnp.sum(maskf)

    @pl.when(step == pl.num_programs(0) - 1)
    def _finalize():
        out_ref[0, 0] = acc_ref[0] / acc_ref[1]


def _softmax_xent_sum_kernel(x_ref, oh_ref, out_ref, acc_ref):
    # x_ref: (TILE, C) logits block, oh_ref: (TILE, C) one-hot targets block.
    # Padding rows have an all-zero one-hot row -> contribute 0 to both sums.
    step = pl.program_id(0)

    @pl.when(step == 0)
    def _init():
        acc_ref[0] = jnp.float32(0.0)
        acc_ref[1] = jnp.float32(0.0)

    x = x_ref[...].astype(jnp.float32)
    oh = oh_ref[...].astype(jnp.float32)
    m = jnp.max(x, axis=-1, keepdims=True)
    lse = m + jnp.log(jnp.sum(jnp.exp(x - m), axis=-1, keepdims=True))
    tgt_logit = jnp.sum(x * oh, axis=-1, keepdims=True)
    validf = jnp.sum(oh, axis=-1, keepdims=True)     # 1.0 real row, 0.0 padding
    acc_ref[0] += jnp.sum((lse - tgt_logit) * validf)
    acc_ref[1] += jnp.sum(validf)

    @pl.when(step == pl.num_programs(0) - 1)
    def _finalize():
        out_ref[0, 0] = acc_ref[0] / acc_ref[1]


# --------------------------------------------------------------------------
# pallas_call wrapper
# --------------------------------------------------------------------------
def _scalar_reduce_call(kernel, grid, in_specs, args):
    out = pl.pallas_call(
        kernel,
        out_shape=jax.ShapeDtypeStruct((1, 1), jnp.float32),
        grid_spec=pltpu.PrefetchScalarGridSpec(
            num_scalar_prefetch=0,
            grid=grid,
            in_specs=in_specs,
            out_specs=pl.BlockSpec(memory_space=pltpu.MemorySpace.SMEM),
            scratch_shapes=[pltpu.SMEM((2,), jnp.float32)],
        ),
        compiler_params=pltpu.CompilerParams(
            dimension_semantics=("arbitrary",),      # sequential reduction axis
            vmem_limit_bytes=_VMEM_LIMIT,
        ),
    )(*args)
    return out[0, 0]


# --------------------------------------------------------------------------
# Branch wrappers
# --------------------------------------------------------------------------
def _masked_bce_with_logits_mean(logits, targets, row_tile=None):
    """Mean BCE-with-logits over entries whose target is not NaN.

    Used for both the binary branch (no NaNs -> plain mean) and the
    multi-label branch (NaN == unlabeled).  Inputs are flattened and repacked
    into a lane-dense (rows, 128) layout; padding targets are NaN so they are
    masked out and never contribute to sum or count.
    """
    x = jnp.asarray(logits)
    if not jnp.issubdtype(x.dtype, jnp.floating):
        x = x.astype(jnp.float32)
    t = jnp.asarray(targets)
    if not jnp.issubdtype(t.dtype, jnp.floating):
        t = t.astype(jnp.float32)
    t = t.reshape(x.shape)

    xf = x.reshape(-1)
    tf = t.reshape(-1)
    m = xf.shape[0]

    rows = max(8, _round_up(_cdiv(m, _LANES), 8))
    if row_tile is None:
        row_tile = _MAX_ROW_TILE
    row_tile = max(8, _round_up(int(row_tile), 8))
    row_tile = min(row_tile, rows)
    rows_pad = _round_up(rows, row_tile)
    total = rows_pad * _LANES

    xf = jnp.pad(xf, (0, total - m))                              # pad logits: 0
    tf = jnp.pad(tf, (0, total - m), constant_values=jnp.nan)     # pad targets: NaN
    x2 = xf.reshape(rows_pad, _LANES)
    t2 = tf.reshape(rows_pad, _LANES)

    grid = (rows_pad // row_tile,)
    spec = pl.BlockSpec((row_tile, _LANES), lambda i: (i, 0))
    return _scalar_reduce_call(_masked_bce_sum_kernel, grid, [spec, spec], (x2, t2))


# Binary branch uses the same kernel; valid targets are never NaN, so the
# masked mean reduces to the plain 'mean' reduction of the PyTorch reference.
_bce_with_logits_mean = _masked_bce_with_logits_mean


def _softmax_cross_entropy_mean(logits, targets, row_tile=None):
    """F.cross_entropy(logits, targets.long()) with 'mean' reduction."""
    x = jnp.asarray(logits)
    if not jnp.issubdtype(x.dtype, jnp.floating):
        x = x.astype(jnp.float32)
    n, c = x.shape
    t = jnp.asarray(targets).reshape(n).astype(jnp.int32)

    if row_tile is None:
        c_lanes = _round_up(c, _LANES)
        budget = 8 * 1024 * 1024                      # 2 inputs x 2 buffers, f32
        bytes_per_row = c_lanes * 4 * 4
        row_tile = max(8, min(_MAX_ROW_TILE, (budget // bytes_per_row) // 8 * 8))
    row_tile = max(8, _round_up(int(row_tile), 8))
    row_tile = min(row_tile, _round_up(n, 8))
    n_pad = _round_up(n, row_tile)

    x = jnp.pad(x, ((0, n_pad - n), (0, 0)))
    t = jnp.pad(t, (0, n_pad - n), constant_values=-1)   # -1 -> all-zero one-hot
    onehot = jax.nn.one_hot(t, c, dtype=x.dtype)

    grid = (n_pad // row_tile,)
    spec = pl.BlockSpec((row_tile, c), lambda i: (i, 0))
    return _scalar_reduce_call(_softmax_xent_sum_kernel, grid, [spec, spec], (x, onehot))


# --------------------------------------------------------------------------
# Criterion module
# --------------------------------------------------------------------------
class Criterion:
    """JAX/Pallas port of gsat.model.Criterion."""

    def __init__(self, num_class, multi_label):
        self.num_class = num_class
        self.multi_label = multi_label
        print(f'[INFO] Using multi_label: {self.multi_label}')

    def __call__(self, logits, targets):
        if self.num_class == 2 and (not self.multi_label):
            return _bce_with_logits_mean(logits, targets)
        elif self.num_class > 2 and (not self.multi_label):
            return _softmax_cross_entropy_mean(logits, targets)
        else:
            return _masked_bce_with_logits_mean(logits, targets)


# --------------------------------------------------------------------------
# Reference (plain JAX) implementations for verification
# --------------------------------------------------------------------------
def _ref_bce(x, t):
    x = x.astype(jnp.float32)
    t = t.astype(jnp.float32)
    e = jnp.maximum(x, 0.0) - x * t + jnp.log1p(jnp.exp(-jnp.abs(x)))
    return jnp.mean(e)


def _ref_masked_bce(x, t):
    x = x.astype(jnp.float32)
    t = t.astype(jnp.float32)
    mask = (t == t)
    ts = jnp.where(mask, t, 0.0)
    e = jnp.maximum(x, 0.0) - x * ts + jnp.log1p(jnp.exp(-jnp.abs(x)))
    return jnp.sum(e * mask) / jnp.sum(mask)


def _ref_ce(x, t):
    x = x.astype(jnp.float32)
    lse = jax.scipy.special.logsumexp(x, axis=-1)
    tgt = jnp.take_along_axis(x, t[:, None], axis=-1)[:, 0]
    return jnp.mean(lse - tgt)


# --------------------------------------------------------------------------
if __name__ == "__main__":
    key = jax.random.PRNGKey(0)
    k1, k2, k3, k4, k5, k6, k7, k8 = jax.random.split(key, 8)

    # Branch 1: binary (num_class == 2, not multi_label)
    N = 8
    logits_bin = jax.random.normal(k1, (N, 1), jnp.float32)
    targets_bin = jax.random.bernoulli(k2, 0.5, (N, 1)).astype(jnp.float32)
    crit_bin = Criterion(num_class=2, multi_label=False)
    loss_bin = jax.block_until_ready(crit_bin(logits_bin, targets_bin))
    assert jnp.allclose(loss_bin, _ref_bce(logits_bin, targets_bin),
                        rtol=1e-5, atol=1e-5)

    # Branch 2: multiclass cross-entropy (num_class > 2, not multi_label)
    Nmc, C = 37, 5
    logits_mc = jax.random.normal(k3, (Nmc, C), jnp.float32)
    targets_mc = jax.random.randint(k4, (Nmc,), 0, C, jnp.int32)
    crit_mc = Criterion(num_class=C, multi_label=False)
    loss_mc = jax.block_until_ready(crit_mc(logits_mc, targets_mc))
    assert jnp.allclose(loss_mc, _ref_ce(logits_mc, targets_mc),
                        rtol=1e-5, atol=1e-5)

    # Branch 3: multi-label with NaN (unlabeled) targets
    L = 4
    logits_ml = jax.random.normal(k5, (N, L), jnp.float32)
    tvals = jax.random.bernoulli(k6, 0.5, (N, L)).astype(jnp.float32)
    nan_mask = jax.random.bernoulli(jax.random.PRNGKey(7), 0.25, (N, L))
    targets_ml = jnp.where(nan_mask, jnp.nan, tvals)
    crit_ml = Criterion(num_class=L, multi_label=True)
    loss_ml = jax.block_until_ready(crit_ml(logits_ml, targets_ml))
    assert jnp.allclose(loss_ml, _ref_masked_bce(logits_ml, targets_ml),
                        rtol=1e-5, atol=1e-5)

    # Multi-tile accumulator paths (small shapes, small row_tile -> grid > 1)
    logits_big = jax.random.normal(k7, (40, 64), jnp.float32)
    targets_big = jax.random.bernoulli(k8, 0.5, (40, 64)).astype(jnp.float32)
    loss_big = jax.block_until_ready(
        _masked_bce_with_logits_mean(logits_big, targets_big, row_tile=8))
    assert jnp.allclose(loss_big, _ref_bce(logits_big, targets_big),
                        rtol=1e-5, atol=1e-5)

    loss_mc_tiled = jax.block_until_ready(
        _softmax_cross_entropy_mean(logits_mc, targets_mc, row_tile=8))
    assert jnp.allclose(loss_mc_tiled, _ref_ce(logits_mc, targets_mc),
                        rtol=1e-5, atol=1e-5)

    print("KERNEL_OK")
</pallas_src>

<mosaic_0001>
module attributes {stable_mosaic.version = 11 : i64} {
  func.func @_masked_bce_sum_kernel(%arg0: i32, %arg1: memref<8x128xf32, #tpu.memory_space<vmem>>, %arg2: memref<8x128xf32, #tpu.memory_space<vmem>>, %arg3: memref<1x1xf32, #tpu.memory_space<smem>>, %arg4: memref<2xf32, #tpu.memory_space<smem>>) attributes {dimension_semantics = [#tpu.dimension_semantics<arbitrary>], iteration_bounds = array<i64: 1>, scalar_prefetch = 0 : i64, scratch_operands = 1 : i64, tpu.core_type = #tpu.core_type<tc>, window_params = [{transform_indices = @transform_0, window_bounds = array<i64: 8, 128>}, {transform_indices = @transform_1, window_bounds = array<i64: 8, 128>}, {transform_indices = @transform_2, window_bounds = array<i64: 1, 1>}]} {
    %c0_i32 = arith.constant 0 : i32
    %0 = arith.cmpi eq, %arg0, %c0_i32 : i32
    %1 = arith.extui %0 : i1 to i32
    %c0_i32_0 = arith.constant 0 : i32
    %2 = arith.cmpi ne, %1, %c0_i32_0 : i32
    scf.if %2 {
      %cst_13 = arith.constant 0.000000e+00 : f32
      %c0_14 = arith.constant 0 : index
      %38 = memref.load %arg4[%c0_14] : memref<2xf32, #tpu.memory_space<smem>>
      memref.store %cst_13, %arg4[%c0_14] : memref<2xf32, #tpu.memory_space<smem>>
      %cst_15 = arith.constant 0.000000e+00 : f32
      %c1_16 = arith.constant 1 : index
      %39 = memref.load %arg4[%c1_16] : memref<2xf32, #tpu.memory_space<smem>>
      memref.store %cst_15, %arg4[%c1_16] : memref<2xf32, #tpu.memory_space<smem>>
    } else {
    }
    %c0 = arith.constant 0 : index
    %c0_1 = arith.constant 0 : index
    %3 = vector.load %arg1[%c0, %c0_1] : memref<8x128xf32, #tpu.memory_space<vmem>>, vector<8x128xf32>
    %c0_2 = arith.constant 0 : index
    %c0_3 = arith.constant 0 : index
    %4 = vector.load %arg2[%c0_2, %c0_3] : memref<8x128xf32, #tpu.memory_space<vmem>>, vector<8x128xf32>
    %5 = arith.cmpf oeq, %4, %4 : vector<8x128xf32>
    %6 = arith.extui %5 : vector<8x128xi1> to vector<8x128xi32>
    %7 = arith.sitofp %6 : vector<8x128xi32> to vector<8x128xf32>
    %cst = arith.constant 0.000000e+00 : f32
    %8 = vector.broadcast %cst : f32 to vector<8x128xf32>
    %9 = arith.select %5, %4, %8 : vector<8x128xi1>, vector<8x128xf32>
    %cst_4 = arith.constant 0.000000e+00 : f32
    %10 = vector.broadcast %cst_4 : f32 to vector<8x128xf32>
    %11 = arith.maximumf %3, %10 : vector<8x128xf32>
    %12 = arith.mulf %3, %9 : vector<8x128xf32>
    %13 = arith.subf %11, %12 : vector<8x128xf32>
    %14 = math.absf %3 : vector<8x128xf32>
    %cst_5 = arith.constant 0.000000e+00 : f32
    %15 = vector.broadcast %cst_5 : f32 to vector<8x128xf32>
    %16 = arith.subf %15, %14 : vector<8x128xf32>
    %17 = math.exp %16 : vector<8x128xf32>
    %18 = math.log1p %17 : vector<8x128xf32>
    %19 = arith.addf %13, %18 : vector<8x128xf32>
    %c0_6 = arith.constant 0 : index
    %20 = memref.load %arg4[%c0_6] : memref<2xf32, #tpu.memory_space<smem>>
    %21 = arith.mulf %19, %7 : vector<8x128xf32>
    %22 = vector.shape_cast %21 : vector<8x128xf32> to vector<1x8x128xf32>
    %cst_7 = arith.constant dense<0.000000e+00> : vector<1xf32>
    %23 = vector.multi_reduction <add>, %22, %cst_7 [1, 2] : vector<1x8x128xf32> to vector<1xf32>
    %24 = vector.shape_cast %23 : vector<1xf32> to vector<1x1x1xf32>
    %25 = vector.extract %24[0, 0, 0] : f32 from vector<1x1x1xf32>
    %26 = arith.addf %20, %25 : f32
    %c0_8 = arith.constant 0 : index
    %27 = memref.load %arg4[%c0_8] : memref<2xf32, #tpu.memory_space<smem>>
    memref.store %26, %arg4[%c0_8] : memref<2xf32, #tpu.memory_space<smem>>
    %c1 = arith.constant 1 : index
    %28 = memref.load %arg4[%c1] : memref<2xf32, #tpu.memory_space<smem>>
    %29 = vector.shape_cast %7 : vector<8x128xf32> to vector<1x8x128xf32>
    %cst_9 = arith.constant dense<0.000000e+00> : vector<1xf32>
    %30 = vector.multi_reduction <add>, %29, %cst_9 [1, 2] : vector<1x8x128xf32> to vector<1xf32>
    %31 = vector.shape_cast %30 : vector<1xf32> to vector<1x1x1xf32>
    %32 = vector.extract %31[0, 0, 0] : f32 from vector<1x1x1xf32>
    %33 = arith.addf %28, %32 : f32
    %c1_10 = arith.constant 1 : index
    %34 = memref.load %arg4[%c1_10] : memref<2xf32, #tpu.memory_space<smem>>
    memref.store %33, %arg4[%c1_10] : memref<2xf32, #tpu.memory_space<smem>>
    %c0_i32_11 = arith.constant 0 : i32
    %35 = arith.cmpi eq, %arg0, %c0_i32_11 : i32
    %36 = arith.extui %35 : i1 to i32
    %c0_i32_12 = arith.constant 0 : i32
    %37 = arith.cmpi ne, %36, %c0_i32_12 : i32
    scf.if %37 {
      %c0_13 = arith.constant 0 : index
      %38 = memref.load %arg4[%c0_13] : memref<2xf32, #tpu.memory_space<smem>>
      %c1_14 = arith.constant 1 : index
      %39 = memref.load %arg4[%c1_14] : memref<2xf32, #tpu.memory_space<smem>>
      %40 = arith.divf %38, %39 : f32
      %c0_15 = arith.constant 0 : index
      %c0_16 = arith.constant 0 : index
      %41 = memref.load %arg3[%c0_15, %c0_16] : memref<1x1xf32, #tpu.memory_space<smem>>
      memref.store %40, %arg3[%c0_15, %c0_16] : memref<1x1xf32, #tpu.memory_space<smem>>
    } else {
    }
    return
  }
  func.func @transform_0(%arg0: i32) -> (i32, i32) {
    %c0_i32 = arith.constant 0 : i32
    %c0_i32_0 = arith.constant 0 : i32
    return %arg0, %c0_i32 : i32, i32
  }
  func.func @transform_1(%arg0: i32) -> (i32, i32) {
    %c0_i32 = arith.constant 0 : i32
    %c0_i32_0 = arith.constant 0 : i32
    return %arg0, %c0_i32 : i32, i32
  }
  func.func @transform_2(%arg0: i32) -> (i32, i32) {
    %c0_i32 = arith.constant 0 : i32
    %c0_i32_0 = arith.constant 0 : i32
    %c0_i32_1 = arith.constant 0 : i32
    return %c0_i32, %c0_i32_0 : i32, i32
  }
}

</mosaic_0001>

<bundles_post_ra>
// kernel: tpu_custom_call.1
= control target key start
LH: loop header
LB: loop body
LE: loop exit
PB: predicated region body
PF: predicated region fallthrough
CT: control target
= control target key end

     0   :  { %7 = vsyncpa [#allocation4], 0  ;;  %s254_s0 = inlined_call_operand.hbm [shape: f32[8,128], index: 0, kind: input, shape index: {}]   ;;  %s255_s1 = inlined_call_operand.hbm [shape: f32[8,128], index: 1, kind: input, shape index: {}]   ;;  %s256_s2 = inlined_call_operand.hbm [shape: f32[1,1], index: 2, kind: output, shape index: {}]  }
   0x1   :  { %8 = vsyncpa [#allocation7], 0 }
   0x2   :  { %9 = vsyncpa [#allocation5], 0  ;;  %s15_s11 = sshll.u32 %s254_s0, 4  ;;  %s224_s12 = smov [#allocation3]   ;;  %s16_s11 = int_to_ptr.hbm [resolvable:$true] %s15_s11 }
   0x3   :  { %s17_s13 = sshll.u32 %s224_s12, 4  ;;  %s26_s16 = sshll.u32 %s255_s1, 4  ;;  %s18_s13 = int_to_ptr.vmem [resolvable:$true] %s17_s13  ;;  %s27_s16 = int_to_ptr.hbm [resolvable:$true] %s26_s16 }
   0x4   :  { %20 = dma.hbm_to_vmem [thread:$0]  %s16_s11, 128, %s18_s13, [#allocation4]  }
   0x5   :  { %s225_s17 = smov [#allocation6]  }
   0x6   :  { %s28_s18 = sshll.u32 %s225_s17, 4  ;;  %s29_s18 = int_to_ptr.vmem [resolvable:$true] %s28_s18 }
   0x7   :  { %31 = dma.hbm_to_vmem [thread:$0]  %s27_s16, 128, %s29_s18, [#allocation7]  }
   0x8   :  { %218 = dma.done.wait [#allocation4], 128  }
   0x9   :  { %219 = vsyncadd [#allocation4], 4294967168 }
   0xa   :  { %220 = dma.done.wait [#allocation7], 128  }
   0xb   :  { %221 = vsyncadd [#allocation7], 4294967168  ;;  %v48_v0 = vld [vmem:[#allocation3] sm:$0xff]  ;;  %v49_v4 = vld [vmem:[#allocation6] sm:$0xff]  ;;  %v226_v17 = vmov 0.0   ;;  %s127_s21 = sshll.u32 %s256_s2, 4  ;;  %s128_s21 = int_to_ptr.hbm [resolvable:$true] %s127_s21 }
   0xc   :  { %v57_v1 = vand.u32 2147483647, %v48_v0  ;;  %vm50_vm0 = vcmp.eq.f32.partialorder %v49_v4, %v49_v4  ;;  %v54_v10 = vmax.f32 %v48_v0, 0.0  ;;  %s227_s24 = smov [#allocation8]  }
   0xd   :  { %v53_v8 = vsel %vm50_vm0, %v49_v4, 0.0  ;;  %v139_v18 = vsel %vm50_vm0, 1.0, %v226_v17 }
   0xe   :  { %v58_v2 = vsub.f32 0.0, %v57_v1  ;;  %v55_v11 = vmul.f32 %v53_v8, %v48_v0 }
  0x10   :  { %v59_v3 = vmul.f32 1.442695, %v58_v2  ;;  %v56_v15 = vsub.f32 %v54_v10, %v55_v11 }
  0x12   :  { %152 = vpow2.f32 %v59_v3 }
  0x18   :  { %v153_v5 = vpop.eup %152 }
  0x19   :  { %v61_v6 = vadd.f32 1.0, %v153_v5  ;;  %v64_v7 = vmul.f32 -0.5, %v153_v5  ;;  %v67_v12 = vand.u32 2147483647, %v153_v5 }
  0x1b   :  { %154 = vlog2.f32 %v61_v6  ;;  %v65_v9 = vadd.f32 1.0, %v64_v7  ;;  %vm68_vm1 = vcmp.lt.f32.partialorder %v67_v12, 0.0004427343 }
  0x1d   :  { %v66_v13 = vmul.f32 %v153_v5, %v65_v9 }
  0x21   :  { %v155_v14 = vpop.eup %154 }
  0x22   :  { %v63_v16 = vmul.f32 0.6931472, %v155_v14 }
  0x24   :  { %v69_v19 = vsel %vm68_vm1, %v66_v13, %v63_v16 }
  0x25   :  { %v70_v20 = vadd.f32 %v69_v19, %v56_v15 }
  0x27   :  { %v72_v21 = vmul.f32 %v139_v18, %v70_v20 }
  0x29   :  { %73 = vadd.xlane.f32.xlu0 %v72_v21 }
  0x31   :  { %86 = vadd.xlane.f32.xlu0 %v139_v18 }
  0x9c   :  { %v74_v22 = vpop.xlane.xlu0 %73 }
  0x9d   :  { %v75_v23 = vrot.slane %v74_v22, 4 }
  0x9f   :  { %v76_v24 = vadd.f32 %v75_v23, %v74_v22 }
  0xa1   :  { %v77_v25 = vrot.slane %v76_v24, 2 }
  0xa3   :  { %v78_v26 = vadd.f32 %v77_v25, %v76_v24 }
  0xa4   :  { %v87_v27 = vpop.xlane.xlu0 %86 }
  0xa5   :  { %v88_v28 = vrot.slane %v87_v27, 4  ;;  %v79_v29 = vrot.slane %v78_v26, 1 }
  0xa7   :  { %v89_v30 = vadd.f32 %v88_v28, %v87_v27  ;;  %v80_v31 = vadd.f32 %v79_v29, %v78_v26 }
  0xa9   :  { %v90_v32 = vrot.slane %v89_v30, 2  ;;  %142 = vpush %v80_v31 }
  0xab   :  { %v91_v33 = vadd.f32 %v90_v32, %v89_v30 }
  0xad   :  { %v92_v34 = vrot.slane %v91_v33, 1 }
  0xaf   :  { %v93_v35 = vadd.f32 %v92_v34, %v91_v33 }
  0xb1   :  { %144 = vpush %v93_v35 }
  0xda   :  { %s143_s0 = spop %142 }
  0xe2   :  { %s145_s1 = spop %144 }
  0xe3   :  { %v103_v36 = vstv %s145_s1 }
  0xe4   :  { %156 = vrcp.f32 %v103_v36  ;;  %v115_v40 = vand.u32 2147483648, %v103_v36  ;;  %v113_v42 = vand.u32 2147483647, %v103_v36  ;;  %vm109_vm3 = vweird.f32 %v103_v36 }
  0xe6   :  { %v116_v44 = vor.u32 1.1754944e-38, %v115_v40  ;;  %vm114_vm5 = vcmp.eq.f32.partialorder %v113_v42, 8.507059e+37 }
  0xea   :  { %v157_v37 = vpop.eup %156 }
  0xeb   :  { %v105_v38 = vmul.f32 %v157_v37, %v103_v36  ;;  %vm110_vm2 = vweird.f32 %v157_v37 }
  0xec   :  { %vm111_vm4 = vmor %vm109_vm3, %vm110_vm2 }
  0xed   :  { %v106_v39 = vsub.f32 1.0, %v105_v38 }
  0xef   :  { %v107_v41 = vmul.f32 %v157_v37, %v106_v39 }
  0xf1   :  { %v108_v43 = vadd.f32 %v157_v37, %v107_v41 }
  0xf3   :  { %v112_v45 = vsel %vm111_vm4, %v157_v37, %v108_v43 }
  0xf4   :  { %v117_v46 = vsel %vm114_vm5, %v116_v44, %v112_v45 }
  0xf5   :  { %146 = vpush %v117_v46 }
 0x126   :  { %s147_s22 = spop %146 }
 0x127   :  { %s119_s23 = smul.f32 %s147_s22, %s143_s0 }
 0x129   :  { %121 = sst [smem:[#allocation8]] %s119_s23 }
 0x12a   :  { %130 = dma.smem_to_hbm %s227_s24, 16, %s128_s21, [#allocation5]  }
 0x12b   :  { %222 = dma.done.wait [#allocation5], 16  }
 0x12c   :  { %223 = vsyncadd [#allocation5], 4294967280 }
 0x12d   :  { %135 = sfence }
 0x12e   :  { %136 = vsyncpa [#allocation4], 1 }
 0x12f   :  { %137 = vsyncpa [#allocation7], 1 }
 0x130   :  { %138 = vsyncpa [#allocation5], 1 }

</bundles_post_ra>
